<compile_context>
chip_gen: v6e
topology: v6e:2x2x1
jax: 0.10.0
libtpu: 0.0.40
codegen_flags: <defaults>
</compile_context>

<pallas_src>
import functools

import jax
import jax.numpy as jnp
from jax.experimental import pallas as pl
from jax.experimental.pallas import tpu as pltpu

HIDDEN = 128
N_ACTIONS = 21
HEAD_PAD = 32            # smallest aligned lane width covering 21 adv + 1 value
DEFAULT_TILE_B = 1024    # multiple of 8; amortises per-grid-step overhead
RESIDENT_SINGLE_BUFFER = False   # set True to single-buffer resident weights


def _round_up(x, m):
    return ((x + m - 1) // m) * m


def _resident_spec(block_shape):
    """BlockSpec for an operand whose index_map is constant (fetched once)."""
    if RESIDENT_SINGLE_BUFFER:
        try:
            return pl.BlockSpec(block_shape, lambda i: (0, 0),
                                pipeline_mode=pl.Buffered(1))
        except (TypeError, AttributeError):
            pass  # older API: fall back to default double-buffering
    return pl.BlockSpec(block_shape, lambda i: (0, 0))


def _dueling_kernel(x_ref, w1_ref, w2_ref, w3_ref, wh_ref, hbias_ref,
                    head_ref, q_ref):
    """One batch tile: 3x (matmul + bias + relu), fused head, dueling combine."""
    wdt = w1_ref.dtype            # MXU input dtype (f32 or bf16)

    # hbias_ref: (8, 128) f32, rows 0..2 = b1, b2, b3
    b1 = hbias_ref[0:1, :]
    b2 = hbias_ref[1:2, :]
    b3 = hbias_ref[2:3, :]
    # head_ref: (8, 32) f32, row 0 = head bias (ba | bv | 0), row 1 = combine c
    bh = head_ref[0:1, :]
    c = head_ref[1:2, :]

    h = jnp.dot(x_ref[...].astype(wdt), w1_ref[...],
                preferred_element_type=jnp.float32)
    h = jnp.maximum(h + b1, 0.0)

    h = jnp.dot(h.astype(wdt), w2_ref[...],
                preferred_element_type=jnp.float32)
    h = jnp.maximum(h + b2, 0.0)

    h = jnp.dot(h.astype(wdt), w3_ref[...],
                preferred_element_type=jnp.float32)
    h = jnp.maximum(h + b3, 0.0)

    # fused heads: cols [0,21) = advantage, col 21 = value, rest zero
    head = jnp.dot(h.astype(wdt), wh_ref[...],
                   preferred_element_type=jnp.float32) + bh

    # dueling combine: s = v - mean(a)  (single 32-lane cross-lane reduction)
    s = jnp.sum(head * c, axis=1, keepdims=True)          # (TILE_B, 1)
    # q[:, :21] = a + v - mean(a); cols 21..31 are garbage, sliced off outside
    q_ref[...] = head + s


def prepare_params(params, weight_dtype=jnp.float32):
    """Build fused head + packed bias operands ONCE (outside any jit loop).

    weight_dtype=jnp.bfloat16 is recommended on v5e (bf16-native MXU); note the
    kernel then also casts activations to bf16 before each matmul.
    """
    w1, b1, w2, b2, w3, b3, wa, ba, wv, bv = params

    # fused head weights: (128, 32) = [ adv(21) | value(1) | zeros(10) ]
    wh = jnp.zeros((HIDDEN, HEAD_PAD), jnp.float32)
    wh = wh.at[:, :N_ACTIONS].set(wa)
    wh = wh.at[:, N_ACTIONS:N_ACTIONS + 1].set(wv)

    # hidden-layer biases packed into one (8, 128) operand (rows 0..2)
    hidden_bias = jnp.zeros((8, HIDDEN), jnp.float32)
    hidden_bias = hidden_bias.at[0].set(b1).at[1].set(b2).at[2].set(b3)

    # head bias + combine vector packed into one (8, 32) operand (rows 0..1)
    head_pack = jnp.zeros((8, HEAD_PAD), jnp.float32)
    head_pack = head_pack.at[0, :N_ACTIONS].set(ba)
    head_pack = head_pack.at[0, N_ACTIONS].set(bv[0])
    comb = jnp.zeros((HEAD_PAD,), jnp.float32)
    comb = comb.at[:N_ACTIONS].set(-1.0 / N_ACTIONS)
    comb = comb.at[N_ACTIONS].set(1.0)
    head_pack = head_pack.at[1].set(comb)

    wdt = weight_dtype
    return (w1.astype(wdt), w2.astype(wdt), w3.astype(wdt), wh.astype(wdt),
            hidden_bias, head_pack)


@functools.partial(jax.jit, static_argnames=("tile_b", "core_parallel"))
def dueling_qnet_forward(x, fused_params, tile_b=DEFAULT_TILE_B,
                         core_parallel=False):
    """x: (B, nS) float32. Returns (B, 21) float32, or (21,) if B == 1.

    core_parallel=True (v7x only): shards the batch grid across both
    TensorCores via pltpu.CORE_PARALLEL and caps the tile so the grid has
    at least two steps.
    """
    w1, w2, w3, wh, hidden_bias, head_pack = fused_params
    B, nS = x.shape

    # batch tile: multiple of 8, capped so tiny batches stay a single block
    tb = min(tile_b, _round_up(B, 8))
    if core_parallel and B > 8:
        # give each v7x TensorCore at least one grid step
        tb = min(tb, max(8, _round_up((B + 1) // 2, 8)))
    tb = _round_up(tb, 8)
    Bp = _round_up(B, tb)
    if Bp != B:                       # skip the pad pass when B % tb == 0
        x = jnp.pad(x, ((0, Bp - B), (0, 0)))
    grid = (Bp // tb,)

    in_specs = [
        pl.BlockSpec((tb, nS), lambda i: (i, 0)),   # x: tiled on batch (nS NOT padded)
        _resident_spec((nS, HIDDEN)),               # w1 (resident)
        _resident_spec((HIDDEN, HIDDEN)),           # w2
        _resident_spec((HIDDEN, HIDDEN)),           # w3
        _resident_spec((HIDDEN, HEAD_PAD)),         # fused head wh (128, 32)
        _resident_spec((8, HIDDEN)),                # packed hidden biases
        _resident_spec((8, HEAD_PAD)),              # head bias + combine vector
    ]
    out_specs = pl.BlockSpec((tb, HEAD_PAD), lambda i: (i, 0))

    semantics = (pltpu.CORE_PARALLEL,) if core_parallel else ("parallel",)

    q_pad = pl.pallas_call(
        _dueling_kernel,
        out_shape=jax.ShapeDtypeStruct((Bp, HEAD_PAD), jnp.float32),
        grid=grid,
        in_specs=in_specs,
        out_specs=out_specs,
        compiler_params=pltpu.CompilerParams(dimension_semantics=semantics),
    )(x, w1, w2, w3, wh, hidden_bias, head_pack)

    q = q_pad[:B, :N_ACTIONS]
    if B == 1:
        q = jnp.squeeze(q, axis=0)
    return q


def default_weight_dtype():
    """bf16 on v5e (f32 MXU is the bottleneck there), f32 elsewhere."""
    try:
        kind = jax.devices()[0].device_kind.lower()
    except Exception:  # pragma: no cover - CPU/interpret fallback
        kind = ""
    return jnp.bfloat16 if "v5 lite" in kind or "v5e" in kind else jnp.float32


def init_params(key, nS):
    """Matches the PyTorch module's initialize_weights():
    kaiming_uniform_ (fan_in, leaky_relu gain -> bound sqrt(6/fan_in)),
    biases = 0."""
    def kaiming_uniform(k, fan_in, shape):
        bound = jnp.sqrt(6.0 / fan_in)
        return jax.random.uniform(k, shape, jnp.float32, -bound, bound)

    ks = jax.random.split(key, 5)
    # stored as (in_features, out_features)
    w1 = kaiming_uniform(ks[0], nS, (nS, HIDDEN))
    b1 = jnp.zeros((HIDDEN,), jnp.float32)
    w2 = kaiming_uniform(ks[1], HIDDEN, (HIDDEN, HIDDEN))
    b2 = jnp.zeros((HIDDEN,), jnp.float32)
    w3 = kaiming_uniform(ks[2], HIDDEN, (HIDDEN, HIDDEN))
    b3 = jnp.zeros((HIDDEN,), jnp.float32)
    wa = kaiming_uniform(ks[3], HIDDEN, (HIDDEN, N_ACTIONS))
    ba = jnp.zeros((N_ACTIONS,), jnp.float32)
    wv = kaiming_uniform(ks[4], HIDDEN, (HIDDEN, 1))
    bv = jnp.zeros((1,), jnp.float32)
    return (w1, b1, w2, b2, w3, b3, wa, ba, wv, bv)


def _reference(x, params):
    w1, b1, w2, b2, w3, b3, wa, ba, wv, bv = params
    h = jnp.maximum(x @ w1 + b1, 0.0)
    h = jnp.maximum(h @ w2 + b2, 0.0)
    h = jnp.maximum(h @ w3 + b3, 0.0)
    a = h @ wa + ba
    v = h @ wv + bv
    q = v + a - jnp.mean(a, axis=1, keepdims=True)
    if x.shape[0] == 1:
        q = jnp.squeeze(q, axis=0)
    return q


if __name__ == "__main__":
    nS = 8   # small state dimension
    B = 2    # batch

    key = jax.random.PRNGKey(0)
    kp, kx = jax.random.split(key)
    params = init_params(kp, nS)
    x = jax.random.normal(kx, (B, nS), jnp.float32)

    # f32 weights (exact parity with the reference)
    fused_f32 = prepare_params(params, jnp.float32)
    q = jax.block_until_ready(dueling_qnet_forward(x, fused_f32))
    q_ref = jax.block_until_ready(_reference(x, params))
    assert q.shape == (B, N_ACTIONS), q.shape
    assert jnp.allclose(q, q_ref, atol=1e-5, rtol=1e-5), (q, q_ref)

    # batch==1 squeeze path
    q1 = jax.block_until_ready(dueling_qnet_forward(x[:1], fused_f32))
    assert q1.shape == (N_ACTIONS,), q1.shape
    assert jnp.allclose(q1, q_ref[0], atol=1e-5, rtol=1e-5)

    # multi-tile grid path (forces batch padding + grid > 1)
    xb = jax.random.normal(jax.random.PRNGKey(1), (20, nS), jnp.float32)
    qb = jax.block_until_ready(dueling_qnet_forward(xb, fused_f32, tile_b=8))
    qb_ref = jax.block_until_ready(_reference(xb, params))
    assert qb.shape == (20, N_ACTIONS), qb.shape
    assert jnp.allclose(qb, qb_ref, atol=1e-5, rtol=1e-5)

    # exact-multiple batch (no pad pass), still grid > 1
    xc = jax.random.normal(jax.random.PRNGKey(2), (32, nS), jnp.float32)
    qc = jax.block_until_ready(dueling_qnet_forward(xc, fused_f32, tile_b=16))
    qc_ref = jax.block_until_ready(_reference(xc, params))
    assert jnp.allclose(qc, qc_ref, atol=1e-5, rtol=1e-5)

    # bf16-weight path (v5e MXU-friendly); looser tolerance vs the f32 reference
    fused_bf16 = prepare_params(params, jnp.bfloat16)
    q_bf = jax.block_until_ready(dueling_qnet_forward(x, fused_bf16))
    assert q_bf.shape == (B, N_ACTIONS), q_bf.shape
    assert jnp.all(jnp.isfinite(q_bf))
    assert jnp.allclose(q_bf, q_ref, atol=0.2, rtol=0.2)

    print("KERNEL_OK")
</pallas_src>

<mosaic_0001>
module attributes {stable_mosaic.version = 11 : i64} {
  func.func @_dueling_kernel(%arg0: i32, %arg1: memref<8x8xf32, #tpu.memory_space<vmem>>, %arg2: memref<8x128xf32, #tpu.memory_space<vmem>>, %arg3: memref<128x128xf32, #tpu.memory_space<vmem>>, %arg4: memref<128x128xf32, #tpu.memory_space<vmem>>, %arg5: memref<128x32xf32, #tpu.memory_space<vmem>>, %arg6: memref<8x128xf32, #tpu.memory_space<vmem>>, %arg7: memref<8x32xf32, #tpu.memory_space<vmem>>, %arg8: memref<8x32xf32, #tpu.memory_space<vmem>>) attributes {dimension_semantics = [#tpu.dimension_semantics<parallel>], iteration_bounds = array<i64: 1>, scalar_prefetch = 0 : i64, scratch_operands = 0 : i64, tpu.core_type = #tpu.core_type<tc>, window_params = [{transform_indices = @transform_0, window_bounds = array<i64: 8, 8>}, {pipeline_mode = #tpu.pipeline_mode<synchronous>, transform_indices = @transform_1, window_bounds = array<i64: 8, 128>}, {pipeline_mode = #tpu.pipeline_mode<synchronous>, transform_indices = @transform_2, window_bounds = array<i64: 128, 128>}, {pipeline_mode = #tpu.pipeline_mode<synchronous>, transform_indices = @transform_3, window_bounds = array<i64: 128, 128>}, {pipeline_mode = #tpu.pipeline_mode<synchronous>, transform_indices = @transform_4, window_bounds = array<i64: 128, 32>}, {pipeline_mode = #tpu.pipeline_mode<synchronous>, transform_indices = @transform_5, window_bounds = array<i64: 8, 128>}, {pipeline_mode = #tpu.pipeline_mode<synchronous>, transform_indices = @transform_6, window_bounds = array<i64: 8, 32>}, {transform_indices = @transform_7, window_bounds = array<i64: 8, 32>}]} {
    %c0 = arith.constant 0 : index
    %c0_0 = arith.constant 0 : index
    %0 = vector.load %arg6[%c0, %c0_0] : memref<8x128xf32, #tpu.memory_space<vmem>>, vector<1x128xf32>
    %c1 = arith.constant 1 : index
    %c0_1 = arith.constant 0 : index
    %1 = vector.load %arg6[%c1, %c0_1] : memref<8x128xf32, #tpu.memory_space<vmem>>, vector<1x128xf32>
    %c2 = arith.constant 2 : index
    %c0_2 = arith.constant 0 : index
    %2 = vector.load %arg6[%c2, %c0_2] : memref<8x128xf32, #tpu.memory_space<vmem>>, vector<1x128xf32>
    %c0_3 = arith.constant 0 : index
    %c0_4 = arith.constant 0 : index
    %3 = vector.load %arg7[%c0_3, %c0_4] : memref<8x32xf32, #tpu.memory_space<vmem>>, vector<1x32xf32>
    %c1_5 = arith.constant 1 : index
    %c0_6 = arith.constant 0 : index
    %4 = vector.load %arg7[%c1_5, %c0_6] : memref<8x32xf32, #tpu.memory_space<vmem>>, vector<1x32xf32>
    %c0_7 = arith.constant 0 : index
    %c0_8 = arith.constant 0 : index
    %5 = vector.load %arg1[%c0_7, %c0_8] : memref<8x8xf32, #tpu.memory_space<vmem>>, vector<8x8xf32>
    %c0_9 = arith.constant 0 : index
    %c0_10 = arith.constant 0 : index
    %6 = vector.load %arg2[%c0_9, %c0_10] : memref<8x128xf32, #tpu.memory_space<vmem>>, vector<8x128xf32>
    %cst = arith.constant dense<0.000000e+00> : vector<8x128xf32>
    %7 = tpu.matmul %5, %6, %cst {dimension_numbers = #tpu.dot_dimension_numbers<[1], [0], [0], [1], [0, 0, 1, 1], [], []>} : vector<8x8xf32>, vector<8x128xf32>, vector<8x128xf32> -> vector<8x128xf32>
    %8 = vector.broadcast %0 : vector<1x128xf32> to vector<8x128xf32>
    %9 = arith.addf %7, %8 : vector<8x128xf32>
    %cst_11 = arith.constant 0.000000e+00 : f32
    %10 = vector.broadcast %cst_11 : f32 to vector<8x128xf32>
    %11 = arith.maximumf %9, %10 : vector<8x128xf32>
    %c0_12 = arith.constant 0 : index
    %c0_13 = arith.constant 0 : index
    %12 = vector.load %arg3[%c0_12, %c0_13] : memref<128x128xf32, #tpu.memory_space<vmem>>, vector<128x128xf32>
    %cst_14 = arith.constant dense<0.000000e+00> : vector<8x128xf32>
    %13 = tpu.matmul %11, %12, %cst_14 {dimension_numbers = #tpu.dot_dimension_numbers<[1], [0], [0], [1], [0, 0, 1, 1], [], []>} : vector<8x128xf32>, vector<128x128xf32>, vector<8x128xf32> -> vector<8x128xf32>
    %14 = vector.broadcast %1 : vector<1x128xf32> to vector<8x128xf32>
    %15 = arith.addf %13, %14 : vector<8x128xf32>
    %cst_15 = arith.constant 0.000000e+00 : f32
    %16 = vector.broadcast %cst_15 : f32 to vector<8x128xf32>
    %17 = arith.maximumf %15, %16 : vector<8x128xf32>
    %c0_16 = arith.constant 0 : index
    %c0_17 = arith.constant 0 : index
    %18 = vector.load %arg4[%c0_16, %c0_17] : memref<128x128xf32, #tpu.memory_space<vmem>>, vector<128x128xf32>
    %cst_18 = arith.constant dense<0.000000e+00> : vector<8x128xf32>
    %19 = tpu.matmul %17, %18, %cst_18 {dimension_numbers = #tpu.dot_dimension_numbers<[1], [0], [0], [1], [0, 0, 1, 1], [], []>} : vector<8x128xf32>, vector<128x128xf32>, vector<8x128xf32> -> vector<8x128xf32>
    %20 = vector.broadcast %2 : vector<1x128xf32> to vector<8x128xf32>
    %21 = arith.addf %19, %20 : vector<8x128xf32>
    %cst_19 = arith.constant 0.000000e+00 : f32
    %22 = vector.broadcast %cst_19 : f32 to vector<8x128xf32>
    %23 = arith.maximumf %21, %22 : vector<8x128xf32>
    %c0_20 = arith.constant 0 : index
    %c0_21 = arith.constant 0 : index
    %24 = vector.load %arg5[%c0_20, %c0_21] : memref<128x32xf32, #tpu.memory_space<vmem>>, vector<128x32xf32>
    %cst_22 = arith.constant dense<0.000000e+00> : vector<8x32xf32>
    %25 = tpu.matmul %23, %24, %cst_22 {dimension_numbers = #tpu.dot_dimension_numbers<[1], [0], [0], [1], [0, 0, 1, 1], [], []>} : vector<8x128xf32>, vector<128x32xf32>, vector<8x32xf32> -> vector<8x32xf32>
    %26 = vector.broadcast %3 : vector<1x32xf32> to vector<8x32xf32>
    %27 = arith.addf %25, %26 : vector<8x32xf32>
    %28 = vector.broadcast %4 : vector<1x32xf32> to vector<8x32xf32>
    %29 = arith.mulf %27, %28 : vector<8x32xf32>
    %cst_23 = arith.constant dense<0.000000e+00> : vector<8xf32>
    %30 = vector.multi_reduction <add>, %29, %cst_23 [1] : vector<8x32xf32> to vector<8xf32>
    %31 = vector.shape_cast %30 : vector<8xf32> to vector<8x1xf32>
    %32 = vector.broadcast %31 : vector<8x1xf32> to vector<8x32xf32>
    %33 = arith.addf %27, %32 : vector<8x32xf32>
    %c0_24 = arith.constant 0 : index
    %c0_25 = arith.constant 0 : index
    %34 = vector.load %arg8[%c0_24, %c0_25] : memref<8x32xf32, #tpu.memory_space<vmem>>, vector<8x32xf32>
    tpu.vector_store %arg8[%c0_24, %c0_25], %33 {strides = array<i32>} : memref<8x32xf32, #tpu.memory_space<vmem>>, vector<8x32xf32>,
    return
  }
  func.func @transform_0(%arg0: i32) -> (i32, i32) {
    %c0_i32 = arith.constant 0 : i32
    %c0_i32_0 = arith.constant 0 : i32
    return %arg0, %c0_i32 : i32, i32
  }
  func.func @transform_1(%arg0: i32) -> (i32, i32) {
    %c0_i32 = arith.constant 0 : i32
    %c0_i32_0 = arith.constant 0 : i32
    %c0_i32_1 = arith.constant 0 : i32
    return %c0_i32, %c0_i32_0 : i32, i32
  }
  func.func @transform_2(%arg0: i32) -> (i32, i32) {
    %c0_i32 = arith.constant 0 : i32
    %c0_i32_0 = arith.constant 0 : i32
    %c0_i32_1 = arith.constant 0 : i32
    return %c0_i32, %c0_i32_0 : i32, i32
  }
  func.func @transform_3(%arg0: i32) -> (i32, i32) {
    %c0_i32 = arith.constant 0 : i32
    %c0_i32_0 = arith.constant 0 : i32
    %c0_i32_1 = arith.constant 0 : i32
    return %c0_i32, %c0_i32_0 : i32, i32
  }
  func.func @transform_4(%arg0: i32) -> (i32, i32) {
    %c0_i32 = arith.constant 0 : i32
    %c0_i32_0 = arith.constant 0 : i32
    %c0_i32_1 = arith.constant 0 : i32
    return %c0_i32, %c0_i32_0 : i32, i32
  }
  func.func @transform_5(%arg0: i32) -> (i32, i32) {
    %c0_i32 = arith.constant 0 : i32
    %c0_i32_0 = arith.constant 0 : i32
    %c0_i32_1 = arith.constant 0 : i32
    return %c0_i32, %c0_i32_0 : i32, i32
  }
  func.func @transform_6(%arg0: i32) -> (i32, i32) {
    %c0_i32 = arith.constant 0 : i32
    %c0_i32_0 = arith.constant 0 : i32
    %c0_i32_1 = arith.constant 0 : i32
    return %c0_i32, %c0_i32_0 : i32, i32
  }
  func.func @transform_7(%arg0: i32) -> (i32, i32) {
    %c0_i32 = arith.constant 0 : i32
    %c0_i32_0 = arith.constant 0 : i32
    return %arg0, %c0_i32 : i32, i32
  }
}

</mosaic_0001>

<bundles_post_ra>
// kernel: dueling_qnet_forward.1
= control target key start
LH: loop header
LB: loop body
LE: loop exit
PB: predicated region body
PF: predicated region fallthrough
CT: control target
= control target key end

     0   :  { %12 = vsyncpa [#allocation3], 0  ;;  %s610_s24 = smov [#allocation2]   ;;  %s835_s0 = inlined_call_operand.vmem [shape: f32[8,8], index: 0, kind: input, shape index: {}]   ;;  %s836_s1 = inlined_call_operand.vmem [shape: f32[8,128], index: 1, kind: input, shape index: {}]   ;;  %s837_s2 = inlined_call_operand.vmem [shape: f32[128,128], index: 2, kind: input, shape index: {}]   ;;  %s838_s3 = inlined_call_operand.hbm [shape: f32[128,128], index: 3, kind: input, shape index: {}]   ;;  %s839_s4 = inlined_call_operand.vmem [shape: f32[128,32], index: 4, kind: input, shape index: {}]   ;;  %s840_s5 = inlined_call_operand.vmem [shape: f32[8,128], index: 5, kind: input, shape index: {}]   ;;  %s841_s6 = inlined_call_operand.vmem [shape: f32[8,32], index: 6, kind: input, shape index: {}]   ;;  %s842_s7 = inlined_call_operand.vmem [shape: f32[8,32], index: 7, kind: output, shape index: {}]  }
   0x1   :  { %s24_s25 = sshll.u32 %s610_s24, 4  ;;  %s25_s25 = int_to_ptr.vmem [resolvable:$true] %s24_s25 }
   0x2   :  { %s596_s26 = scalar_lea.vmem %s25_s25, 2048  ;;  %p601_p1 = scmp.lt.s32.totalorder %s25_s25, %s25_s25 }
   0x3   :  { %p597_p0 = scmp.ne.s32.totalorder %s25_s25, %s596_s26  ;;  %p602_p2 = scmp.lt.s32.totalorder %s596_s26, %s596_s26 }
   0x5   :  { %p603_p3 = por %p602_p2, %p601_p1 }
   0x7   :  { %p604_p4 = pnand %p603_p3, %p597_p0 }
   0x9   :  { %607 = shalt.err (!%p604_p4)
}
   0xa   :  { %s611_s27 = smov 128   ;;  %s612_s28 = smov 8  }
   0xb   :  { %30 = dma.hbm_to_vmem [thread:$0]  %s838_s3, 2048, %s25_s25, [#allocation3], %s611_s27, %s611_s27, %s612_s28  }
   0xc   :  { %608 = dma.done.wait [#allocation3], 2048  }
   0xd   :  { %609 = vsyncadd [#allocation3], 4294965248  ;;  %v613_v0 = vmov 0.0   ;;  %vm614_vm0 = vmmov 0   ;;  %vm51_vm1 = vcmask 64512   ;;  %v46_v1 = vld [vmem:[%s836_s1] sm:$0xff] }
   0xe   :  { %473 = vmatprep.subr.mxu0 %v613_v0  ;;  %475 = vmatprep.mubr.msk.f32.mxu0 %vm614_vm0, %v613_v0  ;;  %v45_v2 = vld [vmem:[%s835_s0] sm:$0xff]  ;;  %v141_v3 = vld [vmem:[%s837_s2 + $0x78] sm:$0xff]  ;;  %v140_v4 = vld [vmem:[%s837_s2 + $0x70] sm:$0xff]  ;;  %vm403_vm2 = vcmask 261120  }
   0xf   :  { %478 = vmatprep.subr.mxu1 %v613_v0  ;;  %510 = vmatprep.mubr.msk.f32.mxu1 %vm614_vm0, %v613_v0  ;;  %v139_v5 = vld [vmem:[%s837_s2 + $0x68] sm:$0xff]  ;;  %v138_v6 = vld [vmem:[%s837_s2 + $0x60] sm:$0xff]  ;;  %v137_v7 = vld [vmem:[%s837_s2 + $0x58] sm:$0xff] }
  0x10   :  { %474 = vmatpush3.msra.mxu0 %v46_v1  ;;  %479 = vmatpush3.msra.mxu1 %v141_v3  ;;  %v136_v8 = vld [vmem:[%s837_s2 + $0x50] sm:$0xff]  ;;  %v135_v9 = vld [vmem:[%s837_s2 + $0x48] sm:$0xff]  ;;  %v134_v10 = vld [vmem:[%s837_s2 + $0x40] sm:$0xff] }
  0x11   :  { %476 = vmatmul.mubr.msk.f32.vlgmr.msra.gmra.mxu0 %vm51_vm1, %v45_v2  ;;  %480 = vmatprep.subr.mxu1 %v613_v0  ;;  %v133_v11 = vld [vmem:[%s837_s2 + $0x38] sm:$0xff]  ;;  %v132_v12 = vld [vmem:[%s837_s2 + $0x30] sm:$0xff]  ;;  %v131_v13 = vld [vmem:[%s837_s2 + $0x28] sm:$0xff] }
  0x12   :  { %481 = vmatpush3.msra.mxu1 %v140_v4  ;;  %513 = vmatprep.subr.mxu0 %v613_v0  ;;  %v130_v14 = vld [vmem:[%s837_s2 + $0x20] sm:$0xff]  ;;  %v129_v15 = vld [vmem:[%s837_s2 + $0x18] sm:$0xff]  ;;  %v128_v16 = vld [vmem:[%s837_s2 + $0x10] sm:$0xff] }
  0x13   :  { %482 = vmatprep.subr.mxu1 %v613_v0  ;;  %545 = vmatprep.mubr.msk.f32.mxu0 %vm614_vm0, %v613_v0  ;;  %v127_v17 = vld [vmem:[%s837_s2 + $0x8] sm:$0xff]  ;;  %v126_v18 = vld [vmem:[%s837_s2] sm:$0xff]  ;;  %v232_v19 = vld [vmem:[#allocation2 + $0x78] sm:$0xff] }
  0x14   :  { %483 = vmatpush3.msra.mxu1 %v139_v5  ;;  %v231_v20 = vld [vmem:[#allocation2 + $0x70] sm:$0xff]  ;;  %514 = vmatpush3.msra.mxu0 %v232_v19  ;;  %v230_v21 = vld [vmem:[#allocation2 + $0x68] sm:$0xff]  ;;  %v229_v22 = vld [vmem:[#allocation2 + $0x60] sm:$0xff] }
  0x15   :  { %484 = vmatprep.subr.mxu1 %v613_v0  ;;  %515 = vmatprep.subr.mxu0 %v613_v0  ;;  %v228_v23 = vld [vmem:[#allocation2 + $0x58] sm:$0xff]  ;;  %v227_v24 = vld [vmem:[#allocation2 + $0x50] sm:$0xff]  ;;  %v226_v25 = vld [vmem:[#allocation2 + $0x48] sm:$0xff] }
  0x16   :  { %485 = vmatpush3.msra.mxu1 %v138_v6  ;;  %516 = vmatpush3.msra.mxu0 %v231_v20  ;;  %v225_v26 = vld [vmem:[#allocation2 + $0x40] sm:$0xff]  ;;  %v224_v27 = vld [vmem:[#allocation2 + $0x38] sm:$0xff]  ;;  %v223_v28 = vld [vmem:[#allocation2 + $0x30] sm:$0xff] }
  0x17   :  { %486 = vmatprep.subr.mxu1 %v613_v0  ;;  %517 = vmatprep.subr.mxu0 %v613_v0  ;;  %v222_v29 = vld [vmem:[#allocation2 + $0x28] sm:$0xff]  ;;  %v221_v30 = vld [vmem:[#allocation2 + $0x20] sm:$0xff]  ;;  %v220_v31 = vld [vmem:[#allocation2 + $0x18] sm:$0xff] }
  0x18   :  { %487 = vmatpush3.msra.mxu1 %v137_v7  ;;  %518 = vmatpush3.msra.mxu0 %v230_v21  ;;  %v414_v32 = vld [vmem:[%s840_s5] ss:$0 sm:$0xff]  ;;  %v219_v37 = vld [vmem:[#allocation2 + $0x10] sm:$0xff]  ;;  %v218_v38 = vld [vmem:[#allocation2 + $0x8] sm:$0xff] }
  0x19   :  { %488 = vmatprep.subr.mxu1 %v613_v0  ;;  %519 = vmatprep.subr.mxu0 %v613_v0  ;;  %v217_v39 = vld [vmem:[#allocation2] sm:$0xff]  ;;  %v323_v40 = vld [vmem:[%s839_s4 + $0x78] sm:$0xff]  ;;  %v322_v41 = vld [vmem:[%s839_s4 + $0x70] sm:$0xff] }
  0x1a   :  { %489 = vmatpush3.msra.mxu1 %v136_v8  ;;  %520 = vmatpush3.msra.mxu0 %v229_v22  ;;  %v321_v42 = vld [vmem:[%s839_s4 + $0x68] sm:$0xff]  ;;  %v320_v43 = vld [vmem:[%s839_s4 + $0x60] sm:$0xff]  ;;  %v319_v44 = vld [vmem:[%s839_s4 + $0x58] sm:$0xff] }
  0x1b   :  { %490 = vmatprep.subr.mxu1 %v613_v0  ;;  %521 = vmatprep.subr.mxu0 %v613_v0  ;;  %v318_v45 = vld [vmem:[%s839_s4 + $0x50] sm:$0xff]  ;;  %v317_v46 = vld [vmem:[%s839_s4 + $0x48] sm:$0xff]  ;;  %v316_v47 = vld [vmem:[%s839_s4 + $0x40] sm:$0xff] }
  0x1c   :  { %491 = vmatpush3.msra.mxu1 %v135_v9  ;;  %522 = vmatpush3.msra.mxu0 %v228_v23  ;;  %v315_v48 = vld [vmem:[%s839_s4 + $0x38] sm:$0xff]  ;;  %v314_v49 = vld [vmem:[%s839_s4 + $0x30] sm:$0xff]  ;;  %v313_v50 = vld [vmem:[%s839_s4 + $0x28] sm:$0xff] }
  0x1d   :  { %492 = vmatprep.subr.mxu1 %v613_v0  ;;  %523 = vmatprep.subr.mxu0 %v613_v0  ;;  %v312_v51 = vld [vmem:[%s839_s4 + $0x20] sm:$0xff]  ;;  %v311_v52 = vld [vmem:[%s839_s4 + $0x18] sm:$0xff]  ;;  %v310_v58 = vld [vmem:[%s839_s4 + $0x10] sm:$0xff] }
  0x1e   :  { %493 = vmatpush3.msra.mxu1 %v134_v10  ;;  %524 = vmatpush3.msra.mxu0 %v227_v24  ;;  %v416_v53 = vld [vmem:[%s840_s5 + $0x1] ss:$0 sm:$0xff]  ;;  %v309_v59 = vld [vmem:[%s839_s4 + $0x8] sm:$0xff]  ;;  %v417_v61 = vld [vmem:[%s840_s5 + $0x2] ss:$0 sm:$0xff] }
  0x1f   :  { %494 = vmatprep.subr.mxu1 %v613_v0  ;;  %525 = vmatprep.subr.mxu0 %v613_v0  ;;  %v308_v60 = vld [vmem:[%s839_s4] sm:$0xff] }
  0x20   :  { %495 = vmatpush3.msra.mxu1 %v133_v11  ;;  %526 = vmatpush3.msra.mxu0 %v226_v25  ;;  %v418_v3 = vld [vmem:[%s841_s6] ss:$0 sm:$0xff] }
  0x21   :  { %496 = vmatprep.subr.mxu1 %v613_v0  ;;  %527 = vmatprep.subr.mxu0 %v613_v0 }
  0x22   :  { %497 = vmatpush3.msra.mxu1 %v132_v12  ;;  %528 = vmatpush3.msra.mxu0 %v225_v26 }
  0x23   :  { %498 = vmatprep.subr.mxu1 %v613_v0  ;;  %529 = vmatprep.subr.mxu0 %v613_v0 }
  0x24   :  { %499 = vmatpush3.msra.mxu1 %v131_v13  ;;  %530 = vmatpush3.msra.mxu0 %v224_v27 }
  0x25   :  { %500 = vmatprep.subr.mxu1 %v613_v0  ;;  %531 = vmatprep.subr.mxu0 %v613_v0 }
  0x26   :  { %501 = vmatpush3.msra.mxu1 %v130_v14  ;;  %532 = vmatpush3.msra.mxu0 %v223_v28 }
  0x27   :  { %502 = vmatprep.subr.mxu1 %v613_v0  ;;  %533 = vmatprep.subr.mxu0 %v613_v0 }
  0x28   :  { %503 = vmatpush3.msra.mxu1 %v129_v15  ;;  %534 = vmatpush3.msra.mxu0 %v222_v29 }
  0x29   :  { %504 = vmatprep.subr.mxu1 %v613_v0  ;;  %535 = vmatprep.subr.mxu0 %v613_v0 }
  0x2a   :  { %505 = vmatpush3.msra.mxu1 %v128_v16  ;;  %536 = vmatpush3.msra.mxu0 %v221_v30 }
  0x2b   :  { %506 = vmatprep.subr.mxu1 %v613_v0  ;;  %537 = vmatprep.subr.mxu0 %v613_v0 }
  0x2c   :  { %507 = vmatpush3.msra.mxu1 %v127_v17  ;;  %538 = vmatpush3.msra.mxu0 %v220_v31 }
  0x2d   :  { %508 = vmatprep.subr.mxu1 %v613_v0  ;;  %539 = vmatprep.subr.mxu0 %v613_v0 }
  0x2e   :  { %509 = vmatpush3.msra.mxu1 %v126_v18  ;;  %540 = vmatpush3.msra.mxu0 %v219_v37 }
  0x2f   :  { %548 = vmatprep.subr.mxu1 %v613_v0  ;;  %541 = vmatprep.subr.mxu0 %v613_v0 }
  0x30   :  { %542 = vmatpush3.msra.mxu0 %v218_v38 }
  0x31   :  { %543 = vmatprep.subr.mxu0 %v613_v0 }
  0x32   :  { %544 = vmatpush3.msra.mxu0 %v217_v39 }
  0xd1   :  { %v121_v33 = vpop.f32.mrf.mxu0 }
  0xd2   :  { %v122_v34 = vadd.f32 %v414_v32, %v121_v33 }
  0xd3   :  { %v477_v35 = vpop.f32.mrf.mxu0 }
  0xd4   :  { %v125_v36 = vmax.f32 %v122_v34, 0.0 }
  0xd6   :  { %511 = vmatmul.mubr.f32.vlgmr.msra.gmra.mxu1 %v125_v36 }
  0xd7   :  { %580 = vmatprep.mubr.msk.f32.mxu1 %vm614_vm0, %v613_v0  ;;  %549 = vmatpush3.msra.mxu1 %v323_v40 }
  0xd8   :  { %550 = vmatprep.subr.mxu1 %v613_v0 }
  0xd9   :  { %551 = vmatpush3.msra.mxu1 %v322_v41 }
  0xda   :  { %552 = vmatprep.subr.mxu1 %v613_v0 }
  0xdb   :  { %553 = vmatpush3.msra.mxu1 %v321_v42 }
  0xdc   :  { %554 = vmatprep.subr.mxu1 %v613_v0 }
  0xdd   :  { %555 = vmatpush3.msra.mxu1 %v320_v43 }
  0xde   :  { %556 = vmatprep.subr.mxu1 %v613_v0 }
  0xdf   :  { %557 = vmatpush3.msra.mxu1 %v319_v44 }
  0xe0   :  { %558 = vmatprep.subr.mxu1 %v613_v0 }
  0xe1   :  { %559 = vmatpush3.msra.mxu1 %v318_v45 }
  0xe2   :  { %560 = vmatprep.subr.mxu1 %v613_v0 }
  0xe3   :  { %561 = vmatpush3.msra.mxu1 %v317_v46 }
  0xe4   :  { %562 = vmatprep.subr.mxu1 %v613_v0 }
  0xe5   :  { %563 = vmatpush3.msra.mxu1 %v316_v47 }
  0xe6   :  { %564 = vmatprep.subr.mxu1 %v613_v0 }
  0xe7   :  { %565 = vmatpush3.msra.mxu1 %v315_v48 }
  0xe8   :  { %566 = vmatprep.subr.mxu1 %v613_v0 }
  0xe9   :  { %567 = vmatpush3.msra.mxu1 %v314_v49 }
  0xea   :  { %568 = vmatprep.subr.mxu1 %v613_v0 }
  0xeb   :  { %569 = vmatpush3.msra.mxu1 %v313_v50 }
  0xec   :  { %570 = vmatprep.subr.mxu1 %v613_v0 }
  0xed   :  { %571 = vmatpush3.msra.mxu1 %v312_v51 }
  0xee   :  { %572 = vmatprep.subr.mxu1 %v613_v0 }
  0xef   :  { %573 = vmatpush3.msra.mxu1 %v311_v52 }
  0xf0   :  { %574 = vmatprep.subr.mxu1 %v613_v0 }
  0xf1   :  { %575 = vmatpush3.msra.mxu1 %v310_v58 }
  0xf2   :  { %576 = vmatprep.subr.mxu1 %v613_v0 }
  0xf3   :  { %577 = vmatpush3.msra.mxu1 %v309_v59 }
  0xf4   :  { %578 = vmatprep.subr.mxu1 %v613_v0  ;;  %v419_v0 = vld [vmem:[%s841_s6 + $0x1] ss:$0 sm:$0xff] }
  0xf5   :  { %579 = vmatpush3.msra.mxu1 %v308_v60 }
 0x196   :  { %v212_v54 = vpop.f32.mrf.mxu1 }
 0x197   :  { %v213_v55 = vadd.f32 %v416_v53, %v212_v54 }
 0x198   :  { %v512_v56 = vpop.f32.mrf.mxu1 }
 0x199   :  { %v216_v57 = vmax.f32 %v213_v55, 0.0 }
 0x19b   :  { %546 = vmatmul.mubr.f32.vlgmr.msra.gmra.mxu0 %v216_v57 }
 0x25b   :  { %v303_v62 = vpop.f32.mrf.mxu0 }
 0x25c   :  { %v304_v63 = vadd.f32 %v417_v61, %v303_v62 }
 0x25d   :  { %v547_v1 = vpop.f32.mrf.mxu0 }
 0x25e   :  { %v307_v2 = vmax.f32 %v304_v63, 0.0 }
 0x260   :  { %581 = vmatmul.mubr.f32.vlgmr.msra.gmra.mxu1 %v307_v2 }
 0x320   :  { %v394_v4 = vpop.f32.mrf.mxu1 }
 0x321   :  { %v395_v5 = vadd.f32 %v418_v3, %v394_v4 }
 0x322   :  { %v582_v6 = vpop.f32.mrf.mxu1 }
 0x323   :  { %v402_v7 = vmul.f32 %v419_v0, %v395_v5 }
 0x325   :  { %v404_v8 = vsel %vm403_vm2, %v402_v7, 0.0 }
 0x326   :  { %405 = vadd.xlane.f32.xlu0 %v404_v8 }
 0x3af   :  { %v406_v9 = vpop.xlane.xlu0 %405 }
 0x3b0   :  { %v407_v10 = vadd.f32 %v406_v9, %v395_v5 }
 0x3b2   :  { %408 = vst.msk [vmem:[%s842_s7] sm:$0xff] %vm403_vm2, %v407_v10 }
 0x3b3   :  { %413 = vsyncpa [#allocation3], 1 }

</bundles_post_ra>
